<compile_context>
chip_gen: v7x
topology: tpu7x:2x2x1
jax: 0.10.0
libtpu: 0.0.40
codegen_flags: <defaults>
</compile_context>

<pallas_src>
import jax
import jax.numpy as jnp
from jax import lax
from jax.experimental import pallas as pl
from jax.experimental.pallas import tpu as pltpu

_CP = 8  # padded channel count = one f32 sublane tile


def _make_kernel(C, H, W):
    Ch = C // 2
    HW = H * W
    CP = _CP
    # tap t = dy*3 + dx; shifted[l] = h2[(l + s) mod HW], s = (dy-1)*W + (dx-1)
    # => roll shift = (-s) mod HW (np.roll semantics).  Every wrapped lane is
    # exactly one of the lanes zeroed by the precomputed boundary masks.
    shifts = [(-((dy - 1) * W + (dx - 1))) % HW for dy in range(3) for dx in range(3)]
    hp = lax.Precision.HIGHEST

    def kernel(x1_ref, x2_ref, taps1_ref, masks_ref,
               w1_ref, b1_ref, w2_ref, b2_ref,
               w3s_ref, b3s_ref, w3t_ref, b3t_ref,
               z_ref, logdet_ref, taps3_ref):
        b = pl.program_id(0)

        # ---- conv1 (3x3, Ch->C, pad 1) + ReLU: one MXU dot on precomputed taps
        h = jnp.dot(w1_ref[...], taps1_ref[0], precision=hp,
                    preferred_element_type=jnp.float32) + b1_ref[...]
        h = jnp.maximum(h, 0.0)                        # (CP, HW); padded rows = 0

        # ---- conv2 (1x1, C->C) + ReLU: one MXU dot
        h2 = jnp.dot(w2_ref[...], h, precision=hp,
                     preferred_element_type=jnp.float32) + b2_ref[...]
        h2 = jnp.maximum(h2, 0.0)                      # (CP, HW); padded rows = 0

        # ---- conv3 (3x3, C->C, pad 1): masked rolled taps staged in VMEM scratch
        for t in range(9):
            if shifts[t] == 0:
                taps3_ref[t * CP:(t + 1) * CP, :] = h2          # center tap, mask==1
            else:
                taps3_ref[t * CP:(t + 1) * CP, :] = (
                    pltpu.roll(h2, shifts[t], axis=1) * masks_ref[t])

        taps3 = taps3_ref[...]                                  # (9*CP, HW)
        # log_s half and t half as separate dots -> offset-0 sublane slices only.
        # (the "+2" of sigmoid(log_s + 2) is folded into b3s in the wrapper)
        pre_s = (jnp.dot(w3s_ref[...], taps3, precision=hp,
                         preferred_element_type=jnp.float32) + b3s_ref[...])[:Ch]
        t_shift = (jnp.dot(w3t_ref[...], taps3, precision=hp,
                           preferred_element_type=jnp.float32) + b3t_ref[...])[:Ch]

        # ---- coupling: numerically-stable log-sigmoid with a single exp
        e = jnp.exp(-jnp.abs(pre_s))
        denom = 1.0 + e
        log_s = jnp.minimum(pre_s, 0.0) - jnp.log(denom)
        s = jnp.where(pre_s >= 0.0, 1.0, e) / denom

        z2 = s * x2_ref[0] + t_shift
        z_ref[0] = jnp.concatenate([x1_ref[0], z2], axis=0)     # full z per image

        # per-image log-determinant (one scalar per grid step)
        logdet_ref[b] = jnp.sum(log_s)

    return kernel


def affine_coupling_forward(x_nchw, params):
    """Forward of AffineCoupling.  x_nchw: (B, C, H, W) float32 (NCHW)."""
    B, C, H, W = x_nchw.shape
    Ch = C // 2
    HW = H * W
    CP = _CP
    K1 = 9 * Ch
    K1P = -(-K1 // 8) * 8          # round up to a sublane tile (24 here)
    K3P = 9 * CP                   # 72

    x = x_nchw.astype(jnp.float32)
    x1 = x[:, :Ch].reshape(B, Ch, HW)      # contiguous reshapes / tiny slices only
    x2 = x[:, Ch:].reshape(B, Ch, HW)

    # conv1 im2col taps (zero-padded 3x3), computed once in XLA (~36 KiB, trivial)
    x1p = jnp.pad(x[:, :Ch], ((0, 0), (0, 0), (1, 1), (1, 1)))
    taps1 = jnp.stack([x1p[:, :, dy:dy + H, dx:dx + W]
                       for dy in range(3) for dx in range(3)], axis=1)
    taps1 = taps1.reshape(B, K1, HW)
    taps1 = jnp.pad(taps1, ((0, 0), (0, K1P - K1), (0, 0)))        # (B, K1P, HW)

    # conv3 boundary masks per tap, pre-broadcast across sublanes (full-vreg vmul)
    ys, xs = jnp.arange(H), jnp.arange(W)
    rows = []
    for dy in range(3):
        for dx in range(3):
            my = ((ys + dy - 1 >= 0) & (ys + dy - 1 < H)).astype(jnp.float32)
            mx = ((xs + dx - 1 >= 0) & (xs + dx - 1 < W)).astype(jnp.float32)
            rows.append((my[:, None] * mx[None, :]).reshape(HW))
    masks = jnp.broadcast_to(jnp.stack(rows)[:, None, :], (9, CP, HW))

    # weights pre-shaped into MXU-friendly (cout_pad, K) matrices, zero-padded
    w1m = jnp.pad(params["w1"].reshape(K1, C).T, ((0, CP - C), (0, K1P - K1)))
    b1c = jnp.pad(params["b1"].reshape(C, 1), ((0, CP - C), (0, 0)))
    w2m = jnp.pad(params["w2"].T, ((0, CP - C), (0, CP - C)))
    b2c = jnp.pad(params["b2"].reshape(C, 1), ((0, CP - C), (0, 0)))
    w3r = jnp.transpose(params["w3"].reshape(9, C, C), (2, 0, 1))  # (cout, t, cin)
    w3p = jnp.pad(w3r, ((0, 0), (0, 0), (0, CP - C)))              # (C, 9, CP)
    w3s = jnp.pad(w3p[:Ch].reshape(Ch, K3P), ((0, CP - Ch), (0, 0)))
    w3t = jnp.pad(w3p[Ch:].reshape(Ch, K3P), ((0, CP - Ch), (0, 0)))
    b3 = params["b3"].reshape(C, 1)
    b3s = jnp.pad(b3[:Ch] + 2.0, ((0, CP - Ch), (0, 0)))           # fold the +2
    b3t = jnp.pad(b3[Ch:], ((0, CP - Ch), (0, 0)))

    kernel = _make_kernel(C, H, W)

    def _img(shape):   # per-image block indexed by the batch grid axis
        return pl.BlockSpec((1,) + shape, lambda b, _s=len(shape): (b,) + (0,) * _s)

    def _rep(shape):   # grid-invariant block (fetched once, stays resident)
        return pl.BlockSpec(shape, lambda b, _s=len(shape): (0,) * _s)

    grid_spec = pltpu.PrefetchScalarGridSpec(
        num_scalar_prefetch=0,
        grid=(B,),
        in_specs=[
            _img((Ch, HW)),                     # x1
            _img((Ch, HW)),                     # x2
            _img((K1P, HW)),                    # conv1 im2col taps
            _rep((9, CP, HW)),                  # conv3 boundary masks
            _rep((CP, K1P)), _rep((CP, 1)),     # w1, b1
            _rep((CP, CP)),  _rep((CP, 1)),     # w2, b2
            _rep((CP, K3P)), _rep((CP, 1)),     # w3 log_s half, b3s (+2 folded)
            _rep((CP, K3P)), _rep((CP, 1)),     # w3 t half,     b3t
        ],
        out_specs=[
            _img((C, HW)),                                      # z (full, per image)
            pl.BlockSpec(memory_space=pltpu.MemorySpace.SMEM),  # log_det (B,)
        ],
        scratch_shapes=[pltpu.VMEM((K3P, HW), jnp.float32)],    # conv3 tap matrix
    )

    flops = 2 * B * HW * (CP * K1P + CP * CP + 2 * CP * K3P)
    transcendentals = 2 * B * Ch * HW
    bytes_accessed = 4 * (2 * B * Ch * HW + B * K1P * HW + 9 * CP * HW
                          + CP * (K1P + 1 + CP + 1 + 2 * (K3P + 1))
                          + B * C * HW + B)

    z_flat, log_det = pl.pallas_call(
        kernel,
        grid_spec=grid_spec,
        out_shape=(
            jax.ShapeDtypeStruct((B, C, HW), jnp.float32),
            jax.ShapeDtypeStruct((B,), jnp.float32),
        ),
        compiler_params=pltpu.CompilerParams(
            # NOTE: flip to ("parallel",) on multi-TensorCore parts (v7x) once the
            # SMEM log_det output is made per-block; at B=2 the win is negligible.
            dimension_semantics=("arbitrary",)),
        cost_estimate=pl.CostEstimate(flops=flops,
                                      transcendentals=transcendentals,
                                      bytes_accessed=bytes_accessed),
    )(x1, x2, taps1, masks, w1m, b1c, w2m, b2c, w3s, b3s, w3t, b3t)

    # (B, C, HW) -> (B, C, H, W): contiguous reshape, no transpose / concat.
    return z_flat.reshape(B, C, H, W), log_det


def init_params(num_channels, key):
    """Deterministic synthetic parameters.  Conv weights stored as (kH,kW,Cin,Cout)."""
    C = num_channels
    Ch = C // 2
    k1, k2, k3, k4, k5, k6 = jax.random.split(key, 6)
    return {
        "w1": 0.3 * jax.random.normal(k1, (3, 3, Ch, C), jnp.float32),
        "b1": 0.05 * jax.random.normal(k2, (1, C), jnp.float32),
        "w2": 0.3 * jax.random.normal(k3, (C, C), jnp.float32),
        "b2": 0.05 * jax.random.normal(k4, (1, C), jnp.float32),
        "w3": 0.3 * jax.random.normal(k5, (3, 3, C, C), jnp.float32),
        "b3": 0.05 * jax.random.normal(k6, (1, C), jnp.float32),
    }


def reference_forward(x_nchw, params):
    """Pure-JAX (XLA) reference matching the PyTorch module semantics."""
    B, C, H, W = x_nchw.shape
    Ch = C // 2
    dn = ("NCHW", "OIHW", "NCHW")
    hp = lax.Precision.HIGHEST

    w1 = jnp.transpose(params["w1"], (3, 2, 0, 1))               # OIHW
    w2 = jnp.transpose(params["w2"], (1, 0))[:, :, None, None]   # OIHW (1x1)
    w3 = jnp.transpose(params["w3"], (3, 2, 0, 1))               # OIHW
    b1, b2, b3 = params["b1"][0], params["b2"][0], params["b3"][0]

    x1, x2 = x_nchw[:, :Ch], x_nchw[:, Ch:]
    h = lax.conv_general_dilated(x1, w1, (1, 1), ((1, 1), (1, 1)),
                                 dimension_numbers=dn, precision=hp)
    h = jnp.maximum(h + b1[None, :, None, None], 0.0)
    h = lax.conv_general_dilated(h, w2, (1, 1), ((0, 0), (0, 0)),
                                 dimension_numbers=dn, precision=hp)
    h = jnp.maximum(h + b2[None, :, None, None], 0.0)
    h = lax.conv_general_dilated(h, w3, (1, 1), ((1, 1), (1, 1)),
                                 dimension_numbers=dn, precision=hp)
    h = h + b3[None, :, None, None]

    log_s, t = h[:, :Ch], h[:, Ch:]
    s = jax.nn.sigmoid(log_s + 2.0)
    z2 = s * x2 + t
    z = jnp.concatenate([x1, z2], axis=1)
    log_det = jnp.sum(jnp.log(s).reshape(B, -1), axis=1)
    return z, log_det


if __name__ == "__main__":
    key = jax.random.PRNGKey(0)
    kx, kp = jax.random.split(key)

    B, C, H, W = 2, 4, 16, 16                 # num_channels = 4
    x = jax.random.normal(kx, (B, C, H, W), jnp.float32)
    params = init_params(C, kp)

    fwd = jax.jit(affine_coupling_forward)
    z, log_det = fwd(x, params)
    (z, log_det) = jax.block_until_ready((z, log_det))

    z_ref, ld_ref = reference_forward(x, params)
    assert z.shape == (B, C, H, W) and log_det.shape == (B,)
    assert jnp.allclose(z, z_ref, rtol=1e-3, atol=1e-3), "z mismatch vs reference"
    assert jnp.allclose(log_det, ld_ref, rtol=1e-3, atol=1e-3), "log_det mismatch vs reference"

    # TODO(synk): inverse() path not implemented (only forward requested).
    print("KERNEL_OK")
</pallas_src>

<mosaic_0001>
module attributes {stable_mosaic.version = 11 : i64} {
  func.func @kernel(%arg0: i32, %arg1: memref<1x2x256xf32, #tpu.memory_space<vmem>>, %arg2: memref<1x2x256xf32, #tpu.memory_space<vmem>>, %arg3: memref<1x24x256xf32, #tpu.memory_space<vmem>>, %arg4: memref<9x8x256xf32, #tpu.memory_space<vmem>>, %arg5: memref<8x24xf32, #tpu.memory_space<vmem>>, %arg6: memref<8x1xf32, #tpu.memory_space<vmem>>, %arg7: memref<8x8xf32, #tpu.memory_space<vmem>>, %arg8: memref<8x1xf32, #tpu.memory_space<vmem>>, %arg9: memref<8x72xf32, #tpu.memory_space<vmem>>, %arg10: memref<8x1xf32, #tpu.memory_space<vmem>>, %arg11: memref<8x72xf32, #tpu.memory_space<vmem>>, %arg12: memref<8x1xf32, #tpu.memory_space<vmem>>, %arg13: memref<1x4x256xf32, #tpu.memory_space<vmem>>, %arg14: memref<2xf32, #tpu.memory_space<smem>>, %arg15: memref<72x256xf32, #tpu.memory_space<vmem>>) attributes {dimension_semantics = [#tpu.dimension_semantics<arbitrary>], iteration_bounds = array<i64: 2>, scalar_prefetch = 0 : i64, scratch_operands = 1 : i64, tpu.core_type = #tpu.core_type<tc>, window_params = [{transform_indices = @transform_0, window_bounds = array<i64: 1, 2, 256>}, {transform_indices = @transform_1, window_bounds = array<i64: 1, 2, 256>}, {transform_indices = @transform_2, window_bounds = array<i64: 1, 24, 256>}, {pipeline_mode = #tpu.pipeline_mode<synchronous>, transform_indices = @transform_3, window_bounds = array<i64: 9, 8, 256>}, {pipeline_mode = #tpu.pipeline_mode<synchronous>, transform_indices = @transform_4, window_bounds = array<i64: 8, 24>}, {pipeline_mode = #tpu.pipeline_mode<synchronous>, transform_indices = @transform_5, window_bounds = array<i64: 8, 1>}, {pipeline_mode = #tpu.pipeline_mode<synchronous>, transform_indices = @transform_6, window_bounds = array<i64: 8, 8>}, {pipeline_mode = #tpu.pipeline_mode<synchronous>, transform_indices = @transform_7, window_bounds = array<i64: 8, 1>}, {pipeline_mode = #tpu.pipeline_mode<synchronous>, transform_indices = @transform_8, window_bounds = array<i64: 8, 72>}, {pipeline_mode = #tpu.pipeline_mode<synchronous>, transform_indices = @transform_9, window_bounds = array<i64: 8, 1>}, {pipeline_mode = #tpu.pipeline_mode<synchronous>, transform_indices = @transform_10, window_bounds = array<i64: 8, 72>}, {pipeline_mode = #tpu.pipeline_mode<synchronous>, transform_indices = @transform_11, window_bounds = array<i64: 8, 1>}, {transform_indices = @transform_12, window_bounds = array<i64: 1, 4, 256>}, {transform_indices = @transform_13, window_bounds = array<i64: 2>}]} {
    %c0 = arith.constant 0 : index
    %c0_0 = arith.constant 0 : index
    %0 = vector.load %arg5[%c0, %c0_0] : memref<8x24xf32, #tpu.memory_space<vmem>>, vector<8x24xf32>
    %c0_1 = arith.constant 0 : index
    %c0_2 = arith.constant 0 : index
    %c0_3 = arith.constant 0 : index
    %1 = vector.load %arg3[%c0_1, %c0_2, %c0_3] : memref<1x24x256xf32, #tpu.memory_space<vmem>>, vector<1x24x256xf32>
    %2 = vector.shape_cast %1 : vector<1x24x256xf32> to vector<24x256xf32>
    %cst = arith.constant dense<0.000000e+00> : vector<8x256xf32>
    %3 = tpu.matmul %0, %2, %cst {dimension_numbers = #tpu.dot_dimension_numbers<[1], [0], [0], [1], [0, 0, 1, 1], [], []>, precision = #tpu.contract_precision<fp32>} : vector<8x24xf32>, vector<24x256xf32>, vector<8x256xf32> -> vector<8x256xf32>
    %c0_4 = arith.constant 0 : index
    %c0_5 = arith.constant 0 : index
    %4 = vector.load %arg6[%c0_4, %c0_5] : memref<8x1xf32, #tpu.memory_space<vmem>>, vector<8x1xf32>
    %5 = vector.broadcast %4 : vector<8x1xf32> to vector<8x256xf32>
    %6 = arith.addf %3, %5 : vector<8x256xf32>
    %cst_6 = arith.constant 0.000000e+00 : f32
    %7 = vector.broadcast %cst_6 : f32 to vector<8x256xf32>
    %8 = arith.maximumf %6, %7 : vector<8x256xf32>
    %c0_7 = arith.constant 0 : index
    %c0_8 = arith.constant 0 : index
    %9 = vector.load %arg7[%c0_7, %c0_8] : memref<8x8xf32, #tpu.memory_space<vmem>>, vector<8x8xf32>
    %cst_9 = arith.constant dense<0.000000e+00> : vector<8x256xf32>
    %10 = tpu.matmul %9, %8, %cst_9 {dimension_numbers = #tpu.dot_dimension_numbers<[1], [0], [0], [1], [0, 0, 1, 1], [], []>, precision = #tpu.contract_precision<fp32>} : vector<8x8xf32>, vector<8x256xf32>, vector<8x256xf32> -> vector<8x256xf32>
    %c0_10 = arith.constant 0 : index
    %c0_11 = arith.constant 0 : index
    %11 = vector.load %arg8[%c0_10, %c0_11] : memref<8x1xf32, #tpu.memory_space<vmem>>, vector<8x1xf32>
    %12 = vector.broadcast %11 : vector<8x1xf32> to vector<8x256xf32>
    %13 = arith.addf %10, %12 : vector<8x256xf32>
    %cst_12 = arith.constant 0.000000e+00 : f32
    %14 = vector.broadcast %cst_12 : f32 to vector<8x256xf32>
    %15 = arith.maximumf %13, %14 : vector<8x256xf32>
    %c17_i32 = arith.constant 17 : i32
    %16 = tpu.dynamic_rotate %15 by %c17_i32 dim 1 : vector<8x256xf32>, i32 -> vector<8x256xf32>
    %c0_13 = arith.constant 0 : index
    %c0_14 = arith.constant 0 : index
    %c0_15 = arith.constant 0 : index
    %17 = vector.load %arg4[%c0_13, %c0_14, %c0_15] : memref<9x8x256xf32, #tpu.memory_space<vmem>>, vector<1x8x256xf32>
    %18 = vector.shape_cast %17 : vector<1x8x256xf32> to vector<8x256xf32>
    %19 = arith.mulf %16, %18 : vector<8x256xf32>
    %c0_16 = arith.constant 0 : index
    %c0_17 = arith.constant 0 : index
    %20 = vector.load %arg15[%c0_16, %c0_17] : memref<72x256xf32, #tpu.memory_space<vmem>>, vector<8x256xf32>
    tpu.vector_store %arg15[%c0_16, %c0_17], %19 {strides = array<i32>} : memref<72x256xf32, #tpu.memory_space<vmem>>, vector<8x256xf32>,
    %c16_i32 = arith.constant 16 : i32
    %21 = tpu.dynamic_rotate %15 by %c16_i32 dim 1 : vector<8x256xf32>, i32 -> vector<8x256xf32>
    %c1 = arith.constant 1 : index
    %c0_18 = arith.constant 0 : index
    %c0_19 = arith.constant 0 : index
    %22 = vector.load %arg4[%c1, %c0_18, %c0_19] : memref<9x8x256xf32, #tpu.memory_space<vmem>>, vector<1x8x256xf32>
    %23 = vector.shape_cast %22 : vector<1x8x256xf32> to vector<8x256xf32>
    %24 = arith.mulf %21, %23 : vector<8x256xf32>
    %c8 = arith.constant 8 : index
    %c0_20 = arith.constant 0 : index
    %25 = vector.load %arg15[%c8, %c0_20] : memref<72x256xf32, #tpu.memory_space<vmem>>, vector<8x256xf32>
    tpu.vector_store %arg15[%c8, %c0_20], %24 {strides = array<i32>} : memref<72x256xf32, #tpu.memory_space<vmem>>, vector<8x256xf32>,
    %c15_i32 = arith.constant 15 : i32
    %26 = tpu.dynamic_rotate %15 by %c15_i32 dim 1 : vector<8x256xf32>, i32 -> vector<8x256xf32>
    %c2 = arith.constant 2 : index
    %c0_21 = arith.constant 0 : index
    %c0_22 = arith.constant 0 : index
    %27 = vector.load %arg4[%c2, %c0_21, %c0_22] : memref<9x8x256xf32, #tpu.memory_space<vmem>>, vector<1x8x256xf32>
    %28 = vector.shape_cast %27 : vector<1x8x256xf32> to vector<8x256xf32>
    %29 = arith.mulf %26, %28 : vector<8x256xf32>
    %c16 = arith.constant 16 : index
    %c0_23 = arith.constant 0 : index
    %30 = vector.load %arg15[%c16, %c0_23] : memref<72x256xf32, #tpu.memory_space<vmem>>, vector<8x256xf32>
    tpu.vector_store %arg15[%c16, %c0_23], %29 {strides = array<i32>} : memref<72x256xf32, #tpu.memory_space<vmem>>, vector<8x256xf32>,
    %c1_i32 = arith.constant 1 : i32
    %31 = tpu.dynamic_rotate %15 by %c1_i32 dim 1 : vector<8x256xf32>, i32 -> vector<8x256xf32>
    %c3 = arith.constant 3 : index
    %c0_24 = arith.constant 0 : index
    %c0_25 = arith.constant 0 : index
    %32 = vector.load %arg4[%c3, %c0_24, %c0_25] : memref<9x8x256xf32, #tpu.memory_space<vmem>>, vector<1x8x256xf32>
    %33 = vector.shape_cast %32 : vector<1x8x256xf32> to vector<8x256xf32>
    %34 = arith.mulf %31, %33 : vector<8x256xf32>
    %c24 = arith.constant 24 : index
    %c0_26 = arith.constant 0 : index
    %35 = vector.load %arg15[%c24, %c0_26] : memref<72x256xf32, #tpu.memory_space<vmem>>, vector<8x256xf32>
    tpu.vector_store %arg15[%c24, %c0_26], %34 {strides = array<i32>} : memref<72x256xf32, #tpu.memory_space<vmem>>, vector<8x256xf32>,
    %c32 = arith.constant 32 : index
    %c0_27 = arith.constant 0 : index
    %36 = vector.load %arg15[%c32, %c0_27] : memref<72x256xf32, #tpu.memory_space<vmem>>, vector<8x256xf32>
    tpu.vector_store %arg15[%c32, %c0_27], %15 {strides = array<i32>} : memref<72x256xf32, #tpu.memory_space<vmem>>, vector<8x256xf32>,
    %c255_i32 = arith.constant 255 : i32
    %37 = tpu.dynamic_rotate %15 by %c255_i32 dim 1 : vector<8x256xf32>, i32 -> vector<8x256xf32>
    %c5 = arith.constant 5 : index
    %c0_28 = arith.constant 0 : index
    %c0_29 = arith.constant 0 : index
    %38 = vector.load %arg4[%c5, %c0_28, %c0_29] : memref<9x8x256xf32, #tpu.memory_space<vmem>>, vector<1x8x256xf32>
    %39 = vector.shape_cast %38 : vector<1x8x256xf32> to vector<8x256xf32>
    %40 = arith.mulf %37, %39 : vector<8x256xf32>
    %c40 = arith.constant 40 : index
    %c0_30 = arith.constant 0 : index
    %41 = vector.load %arg15[%c40, %c0_30] : memref<72x256xf32, #tpu.memory_space<vmem>>, vector<8x256xf32>
    tpu.vector_store %arg15[%c40, %c0_30], %40 {strides = array<i32>} : memref<72x256xf32, #tpu.memory_space<vmem>>, vector<8x256xf32>,
    %c241_i32 = arith.constant 241 : i32
    %42 = tpu.dynamic_rotate %15 by %c241_i32 dim 1 : vector<8x256xf32>, i32 -> vector<8x256xf32>
    %c6 = arith.constant 6 : index
    %c0_31 = arith.constant 0 : index
    %c0_32 = arith.constant 0 : index
    %43 = vector.load %arg4[%c6, %c0_31, %c0_32] : memref<9x8x256xf32, #tpu.memory_space<vmem>>, vector<1x8x256xf32>
    %44 = vector.shape_cast %43 : vector<1x8x256xf32> to vector<8x256xf32>
    %45 = arith.mulf %42, %44 : vector<8x256xf32>
    %c48 = arith.constant 48 : index
    %c0_33 = arith.constant 0 : index
    %46 = vector.load %arg15[%c48, %c0_33] : memref<72x256xf32, #tpu.memory_space<vmem>>, vector<8x256xf32>
    tpu.vector_store %arg15[%c48, %c0_33], %45 {strides = array<i32>} : memref<72x256xf32, #tpu.memory_space<vmem>>, vector<8x256xf32>,
    %c240_i32 = arith.constant 240 : i32
    %47 = tpu.dynamic_rotate %15 by %c240_i32 dim 1 : vector<8x256xf32>, i32 -> vector<8x256xf32>
    %c7 = arith.constant 7 : index
    %c0_34 = arith.constant 0 : index
    %c0_35 = arith.constant 0 : index
    %48 = vector.load %arg4[%c7, %c0_34, %c0_35] : memref<9x8x256xf32, #tpu.memory_space<vmem>>, vector<1x8x256xf32>
    %49 = vector.shape_cast %48 : vector<1x8x256xf32> to vector<8x256xf32>
    %50 = arith.mulf %47, %49 : vector<8x256xf32>
    %c56 = arith.constant 56 : index
    %c0_36 = arith.constant 0 : index
    %51 = vector.load %arg15[%c56, %c0_36] : memref<72x256xf32, #tpu.memory_space<vmem>>, vector<8x256xf32>
    tpu.vector_store %arg15[%c56, %c0_36], %50 {strides = array<i32>} : memref<72x256xf32, #tpu.memory_space<vmem>>, vector<8x256xf32>,
    %c239_i32 = arith.constant 239 : i32
    %52 = tpu.dynamic_rotate %15 by %c239_i32 dim 1 : vector<8x256xf32>, i32 -> vector<8x256xf32>
    %c8_37 = arith.constant 8 : index
    %c0_38 = arith.constant 0 : index
    %c0_39 = arith.constant 0 : index
    %53 = vector.load %arg4[%c8_37, %c0_38, %c0_39] : memref<9x8x256xf32, #tpu.memory_space<vmem>>, vector<1x8x256xf32>
    %54 = vector.shape_cast %53 : vector<1x8x256xf32> to vector<8x256xf32>
    %55 = arith.mulf %52, %54 : vector<8x256xf32>
    %c64 = arith.constant 64 : index
    %c0_40 = arith.constant 0 : index
    %56 = vector.load %arg15[%c64, %c0_40] : memref<72x256xf32, #tpu.memory_space<vmem>>, vector<8x256xf32>
    tpu.vector_store %arg15[%c64, %c0_40], %55 {strides = array<i32>} : memref<72x256xf32, #tpu.memory_space<vmem>>, vector<8x256xf32>,
    %c0_41 = arith.constant 0 : index
    %c0_42 = arith.constant 0 : index
    %57 = vector.load %arg15[%c0_41, %c0_42] : memref<72x256xf32, #tpu.memory_space<vmem>>, vector<72x256xf32>
    %c0_43 = arith.constant 0 : index
    %c0_44 = arith.constant 0 : index
    %58 = vector.load %arg9[%c0_43, %c0_44] : memref<8x72xf32, #tpu.memory_space<vmem>>, vector<8x72xf32>
    %cst_45 = arith.constant dense<0.000000e+00> : vector<8x256xf32>
    %59 = tpu.matmul %58, %57, %cst_45 {dimension_numbers = #tpu.dot_dimension_numbers<[1], [0], [0], [1], [0, 0, 1, 1], [], []>, precision = #tpu.contract_precision<fp32>} : vector<8x72xf32>, vector<72x256xf32>, vector<8x256xf32> -> vector<8x256xf32>
    %c0_46 = arith.constant 0 : index
    %c0_47 = arith.constant 0 : index
    %60 = vector.load %arg10[%c0_46, %c0_47] : memref<8x1xf32, #tpu.memory_space<vmem>>, vector<8x1xf32>
    %61 = vector.broadcast %60 : vector<8x1xf32> to vector<8x256xf32>
    %62 = arith.addf %59, %61 : vector<8x256xf32>
    %63 = vector.extract_strided_slice %62 {offsets = [0, 0], sizes = [2, 256], strides = [1, 1]} : vector<8x256xf32> to vector<2x256xf32>
    %c0_48 = arith.constant 0 : index
    %c0_49 = arith.constant 0 : index
    %64 = vector.load %arg11[%c0_48, %c0_49] : memref<8x72xf32, #tpu.memory_space<vmem>>, vector<8x72xf32>
    %cst_50 = arith.constant dense<0.000000e+00> : vector<8x256xf32>
    %65 = tpu.matmul %64, %57, %cst_50 {dimension_numbers = #tpu.dot_dimension_numbers<[1], [0], [0], [1], [0, 0, 1, 1], [], []>, precision = #tpu.contract_precision<fp32>} : vector<8x72xf32>, vector<72x256xf32>, vector<8x256xf32> -> vector<8x256xf32>
    %c0_51 = arith.constant 0 : index
    %c0_52 = arith.constant 0 : index
    %66 = vector.load %arg12[%c0_51, %c0_52] : memref<8x1xf32, #tpu.memory_space<vmem>>, vector<8x1xf32>
    %67 = vector.broadcast %66 : vector<8x1xf32> to vector<8x256xf32>
    %68 = arith.addf %65, %67 : vector<8x256xf32>
    %69 = vector.extract_strided_slice %68 {offsets = [0, 0], sizes = [2, 256], strides = [1, 1]} : vector<8x256xf32> to vector<2x256xf32>
    %70 = math.absf %63 : vector<2x256xf32>
    %cst_53 = arith.constant 0.000000e+00 : f32
    %71 = vector.broadcast %cst_53 : f32 to vector<2x256xf32>
    %72 = arith.subf %71, %70 : vector<2x256xf32>
    %73 = math.exp %72 : vector<2x256xf32>
    %cst_54 = arith.constant 1.000000e+00 : f32
    %74 = vector.broadcast %cst_54 : f32 to vector<2x256xf32>
    %75 = arith.addf %74, %73 : vector<2x256xf32>
    %cst_55 = arith.constant 0.000000e+00 : f32
    %76 = vector.broadcast %cst_55 : f32 to vector<2x256xf32>
    %77 = arith.minimumf %63, %76 : vector<2x256xf32>
    %78 = math.log %75 : vector<2x256xf32>
    %79 = arith.subf %77, %78 : vector<2x256xf32>
    %cst_56 = arith.constant 0.000000e+00 : f32
    %80 = vector.broadcast %cst_56 : f32 to vector<2x256xf32>
    %81 = arith.cmpf oge, %63, %80 : vector<2x256xf32>
    %cst_57 = arith.constant 1.000000e+00 : f32
    %82 = vector.broadcast %cst_57 : f32 to vector<2x256xf32>
    %83 = arith.select %81, %82, %73 : vector<2x256xi1>, vector<2x256xf32>
    %84 = arith.divf %83, %75 : vector<2x256xf32>
    %c0_58 = arith.constant 0 : index
    %c0_59 = arith.constant 0 : index
    %c0_60 = arith.constant 0 : index
    %85 = vector.load %arg2[%c0_58, %c0_59, %c0_60] : memref<1x2x256xf32, #tpu.memory_space<vmem>>, vector<1x2x256xf32>
    %86 = vector.shape_cast %85 : vector<1x2x256xf32> to vector<2x256xf32>
    %87 = arith.mulf %84, %86 : vector<2x256xf32>
    %88 = arith.addf %87, %69 : vector<2x256xf32>
    %c0_61 = arith.constant 0 : index
    %c0_62 = arith.constant 0 : index
    %c0_63 = arith.constant 0 : index
    %89 = vector.load %arg1[%c0_61, %c0_62, %c0_63] : memref<1x2x256xf32, #tpu.memory_space<vmem>>, vector<1x2x256xf32>
    %90 = vector.shape_cast %89 : vector<1x2x256xf32> to vector<2x256xf32>
    %91 = tpu.concatenate %90, %88 in 0 : vector<2x256xf32>, vector<2x256xf32> -> vector<4x256xf32>
    %c0_64 = arith.constant 0 : index
    %c0_65 = arith.constant 0 : index
    %c0_66 = arith.constant 0 : index
    %92 = vector.load %arg13[%c0_64, %c0_65, %c0_66] : memref<1x4x256xf32, #tpu.memory_space<vmem>>, vector<1x4x256xf32>
    %93 = vector.shape_cast %92 : vector<1x4x256xf32> to vector<4x256xf32>
    %94 = vector.shape_cast %91 : vector<4x256xf32> to vector<1x4x256xf32>
    tpu.vector_store %arg13[%c0_64, %c0_65, %c0_66], %94 {strides = array<i32>} : memref<1x4x256xf32, #tpu.memory_space<vmem>>, vector<1x4x256xf32>,
    %95 = vector.shape_cast %79 : vector<2x256xf32> to vector<1x2x256xf32>
    %cst_67 = arith.constant dense<0.000000e+00> : vector<1xf32>
    %96 = vector.multi_reduction <add>, %95, %cst_67 [1, 2] : vector<1x2x256xf32> to vector<1xf32>
    %97 = vector.shape_cast %96 : vector<1xf32> to vector<1x1x1xf32>
    %98 = vector.extract %97[0, 0, 0] : f32 from vector<1x1x1xf32>
    %99 = arith.index_cast %arg0 : i32 to index
    %100 = memref.load %arg14[%99] : memref<2xf32, #tpu.memory_space<smem>>
    memref.store %98, %arg14[%99] : memref<2xf32, #tpu.memory_space<smem>>
    return
  }
  func.func @transform_0(%arg0: i32) -> (i32, i32, i32) {
    %c0_i32 = arith.constant 0 : i32
    %c0_i32_0 = arith.constant 0 : i32
    %c0_i32_1 = arith.constant 0 : i32
    return %arg0, %c0_i32, %c0_i32_0 : i32, i32, i32
  }
  func.func @transform_1(%arg0: i32) -> (i32, i32, i32) {
    %c0_i32 = arith.constant 0 : i32
    %c0_i32_0 = arith.constant 0 : i32
    %c0_i32_1 = arith.constant 0 : i32
    return %arg0, %c0_i32, %c0_i32_0 : i32, i32, i32
  }
  func.func @transform_2(%arg0: i32) -> (i32, i32, i32) {
    %c0_i32 = arith.constant 0 : i32
    %c0_i32_0 = arith.constant 0 : i32
    %c0_i32_1 = arith.constant 0 : i32
    return %arg0, %c0_i32, %c0_i32_0 : i32, i32, i32
  }
  func.func @transform_3(%arg0: i32) -> (i32, i32, i32) {
    %c0_i32 = arith.constant 0 : i32
    %c0_i32_0 = arith.constant 0 : i32
    %c0_i32_1 = arith.constant 0 : i32
    %c0_i32_2 = arith.constant 0 : i32
    return %c0_i32, %c0_i32_0, %c0_i32_1 : i32, i32, i32
  }
  func.func @transform_4(%arg0: i32) -> (i32, i32) {
    %c0_i32 = arith.constant 0 : i32
    %c0_i32_0 = arith.constant 0 : i32
    %c0_i32_1 = arith.constant 0 : i32
    return %c0_i32, %c0_i32_0 : i32, i32
  }
  func.func @transform_5(%arg0: i32) -> (i32, i32) {
    %c0_i32 = arith.constant 0 : i32
    %c0_i32_0 = arith.constant 0 : i32
    %c0_i32_1 = arith.constant 0 : i32
    return %c0_i32, %c0_i32_0 : i32, i32
  }
  func.func @transform_6(%arg0: i32) -> (i32, i32) {
    %c0_i32 = arith.constant 0 : i32
    %c0_i32_0 = arith.constant 0 : i32
    %c0_i32_1 = arith.constant 0 : i32
    return %c0_i32, %c0_i32_0 : i32, i32
  }
  func.func @transform_7(%arg0: i32) -> (i32, i32) {
    %c0_i32 = arith.constant 0 : i32
    %c0_i32_0 = arith.constant 0 : i32
    %c0_i32_1 = arith.constant 0 : i32
    return %c0_i32, %c0_i32_0 : i32, i32
  }
  func.func @transform_8(%arg0: i32) -> (i32, i32) {
    %c0_i32 = arith.constant 0 : i32
    %c0_i32_0 = arith.constant 0 : i32
    %c0_i32_1 = arith.constant 0 : i32
    return %c0_i32, %c0_i32_0 : i32, i32
  }
  func.func @transform_9(%arg0: i32) -> (i32, i32) {
    %c0_i32 = arith.constant 0 : i32
    %c0_i32_0 = arith.constant 0 : i32
    %c0_i32_1 = arith.constant 0 : i32
    return %c0_i32, %c0_i32_0 : i32, i32
  }
  func.func @transform_10(%arg0: i32) -> (i32, i32) {
    %c0_i32 = arith.constant 0 : i32
    %c0_i32_0 = arith.constant 0 : i32
    %c0_i32_1 = arith.constant 0 : i32
    return %c0_i32, %c0_i32_0 : i32, i32
  }
  func.func @transform_11(%arg0: i32) -> (i32, i32) {
    %c0_i32 = arith.constant 0 : i32
    %c0_i32_0 = arith.constant 0 : i32
    %c0_i32_1 = arith.constant 0 : i32
    return %c0_i32, %c0_i32_0 : i32, i32
  }
  func.func @transform_12(%arg0: i32) -> (i32, i32, i32) {
    %c0_i32 = arith.constant 0 : i32
    %c0_i32_0 = arith.constant 0 : i32
    %c0_i32_1 = arith.constant 0 : i32
    return %arg0, %c0_i32, %c0_i32_0 : i32, i32, i32
  }
  func.func @transform_13(%arg0: i32) -> i32 {
    %c0_i32 = arith.constant 0 : i32
    %c0_i32_0 = arith.constant 0 : i32
    return %c0_i32 : i32
  }
}

</mosaic_0001>

<bundles_post_ra>
// kernel: affine_coupling_forward.1
= control target key start
LH: loop header
LB: loop body
LE: loop exit
PB: predicated region body
PF: predicated region fallthrough
CT: control target
= control target key end

     0   :  { %19 = vsyncpa [#allocation4], 0  ;;  %s3627_s25 = smov 0   ;;  %s4158_s0 = inlined_call_operand.vmem [shape: f32[2,2,256], index: 0, kind: input, shape index: {}]   ;;  %s4159_s1 = inlined_call_operand.vmem [shape: f32[2,2,256], index: 1, kind: input, shape index: {}]   ;;  %s4160_s2 = inlined_call_operand.vmem [shape: f32[2,24,256], index: 2, kind: input, shape index: {}]   ;;  %s4161_s3 = inlined_call_operand.vmem [shape: f32[9,8,256], index: 3, kind: input, shape index: {}]   ;;  %s4162_s4 = inlined_call_operand.vmem [shape: f32[8,24], index: 4, kind: input, shape index: {}]   ;;  %s4163_s5 = inlined_call_operand.vmem [shape: f32[8,1], index: 5, kind: input, shape index: {}]   ;;  %s4164_s6 = inlined_call_operand.vmem [shape: f32[8,8], index: 6, kind: input, shape index: {}]   ;;  %s4165_s7 = inlined_call_operand.vmem [shape: f32[8,1], index: 7, kind: input, shape index: {}]   ;;  %s4166_s8 = inlined_call_operand.vmem [shape: f32[8,72], index: 8, kind: input, shape index: {}]   ;;  %s4167_s9 = inlined_call_operand.vmem [shape: f32[8,1], index: 9, kind: input, shape index: {}]   ;;  %s4168_s10 = inlined_call_operand.vmem [shape: f32[8,72], index: 10, kind: input, shape index: {}]   ;;  %s4169_s11 = inlined_call_operand.vmem [shape: f32[8,1], index: 11, kind: input, shape index: {}]   ;;  %s4170_s12 = inlined_call_operand.vmem [shape: f32[2,4,256], index: 12, kind: output, shape index: {0}]   ;;  %s4171_s13 = inlined_call_operand.hbm [shape: f32[2], index: 13, kind: output, shape index: {1}]  }
   0x1 LB: > { %s3633_s26 = sadd.s32 4294967295, %s3544_s25   ;;  %p3183_p0 = scmp.ge.s32.totalorder %s3544_s25, 1  ;;  %s3544_s25 = sphi %s3627_s25, %s25_s25  }
   0x2   : > { %p406_p1 = scmp.lt.s32.totalorder %s3544_s25, 3 }
   0x4   : > { %p407_p2 = pnand %p3183_p0, %p406_p1 }
   0x5   : > { %p460_p3 = scmp.lt.s32.totalorder (!%p407_p2), %s3633_s26, 1  ;;  %v480_v0 = vld [vmem:[%s4162_s4] sm:$0xff] (!%p407_p2)  ;;  %vm493_vm0 = vcmask (!%p407_p2), 195584   ;;  %v3546_v2 = vmov (!%p407_p2), 0.0   ;;  %v3547_v4 = vmov (!%p407_p2), 0   ;;  %vm1023_vm1 = vcmask (!%p407_p2), 64512  }
   0x6   : > { %410 = sbr.rel (%p407_p2) target bundleno = 1262 (0x4ee), region = 68  ;;  %v487_v1 = vld [vmem:[%s4163_s5] sm:$0xff] (!%p407_p2)  ;;  %673 = vmatprep.mubr.f32.mxu0 (!%p407_p2), %v3546_v2  ;;  %567 = vmatprep.mubr.f32.mxu1 (!%p407_p2), %v3546_v2  ;;  %v495_v3 = vsel (!%p407_p2), %vm493_vm0, %v480_v0, 0  ;;  %s3548_s23 = smov (!%p407_p2), 16   ;;  %vm1634_vm3 = vcmask (!%p407_p2), 588800   ;;  %vm3054_vm13 = vcmask (!%p407_p2), 1041408  }
   0x7   : > { %3509 = vset.pattern.permute.xlu0 (!%p407_p2), %v3547_v4  ;;  %v1017_v5 = vld [vmem:[%s4165_s7] sm:$0xff] (!%p407_p2)  ;;  %v3653_v6 = vand.u32 (!%p407_p2), 4294901760, %v495_v3  ;;  %s3549_s24 = smov (!%p407_p2), 17   ;;  %s3550_s27 = smov (!%p407_p2), 15  }
   0x8   : > { %490 = vperm.xlu0 (!%p407_p2), %3509, %v487_v1   ;;  %v1016_v57 = vld [vmem:[%s4164_s6] sm:$0xff] (!%p407_p2)  ;;  %s3551_s28 = smov (!%p407_p2), 1   ;;  %s3552_s29 = smov (!%p407_p2), 127  }
   0x9   : > { %v3659_v10 = vsub.f32 (!%p407_p2), %v495_v3, %v3653_v6  ;;  %v1025_v58 = vsel (!%p407_p2), %vm1023_vm1, %v1016_v57, 0  ;;  %s3553_s30 = smov (!%p407_p2), 113   ;;  %s3555_s16 = smov (!%p407_p2), 111  }
   0xa   : > { %v1094_v59 = vand.u32 (!%p407_p2), 4294901760, %v1025_v58  ;;  %p3488_p4 = scmp.eq.s32.totalorder (!%p407_p2), %s3633_s26, 1 }
   0xb   : > { %v570_v20 = vand.u32 (!%p407_p2), 4294901760, %v3659_v10 }
   0xc   : > { %1020 = vperm.xlu0 (!%p407_p2), %3509, %v1017_v5   ;;  %v1095_v60 = vsub.f32 (!%p407_p2), %v1025_v58, %v1094_v59 }
   0xd   : > { %s3647_s14 = scalar_select %p460_p3, %s3633_s26, 1  ;;  %v571_v32 = vsub.f32 %v3659_v10, %v570_v20 }
   0xe   : > { %v1096_v0 = vand.u32 4294901760, %v1095_v60 }
   0xf   : > { %s3481_s15 = smul.u32 48, %s3647_s14  ;;  %v572_v44 = vand.u32 4294901760, %v571_v32  ;;  %s3214_s22 = sshll.u32 %s3647_s14, 3 }
  0x11   : > { %s474_s20 = scalar_lea.vmem %s4160_s2, %s3481_s15  ;;  %s3554_s15 = smov 112  }
  0x12   : > { %v482_v7 = vld [vmem:[%s474_s20 + $0x8] sm:$0xff]  ;;  %v484_v8 = vld [vmem:[%s474_s20 + $0x18] sm:$0xff]  ;;  %v481_v9 = vld [vmem:[%s474_s20] sm:$0xff] }
  0x13   : > { %v497_v11 = vand.u32 4294901760, %v482_v7  ;;  %v501_v12 = vand.u32 4294901760, %v484_v8  ;;  %v483_v13 = vld [vmem:[%s474_s20 + $0x10] sm:$0xff]  ;;  %v499_v14 = vand.u32 4294901760, %v481_v9  ;;  %v486_v15 = vld [vmem:[%s474_s20 + $0x28] sm:$0xff]  ;;  %v485_v16 = vld [vmem:[%s474_s20 + $0x20] sm:$0xff] }
  0x14   : > { %v503_v17 = vand.u32 4294901760, %v483_v13  ;;  %v3661_v18 = vand.u32 4294901760, %v486_v15  ;;  %v3663_v19 = vand.u32 4294901760, %v485_v16 }
  0x15   : > { %v580_v21 = vsub.f32 %v482_v7, %v497_v11  ;;  %v592_v22 = vsub.f32 %v484_v8, %v501_v12  ;;  %v586_v23 = vsub.f32 %v481_v9, %v499_v14  ;;  %v3217_v24 = vpack.c.bf16 %v501_v12, %v497_v11 }
  0x16   : > { %v598_v25 = vsub.f32 %v483_v13, %v503_v17  ;;  %v604_v26 = vsub.f32 %v486_v15, %v3661_v18  ;;  %v610_v27 = vsub.f32 %v485_v16, %v3663_v19  ;;  %v3219_v28 = vpack.c.bf16 %v503_v17, %v499_v14 }
  0x17   : > { %v581_v29 = vand.u32 4294901760, %v580_v21  ;;  %v593_v30 = vand.u32 4294901760, %v592_v22  ;;  %v587_v31 = vand.u32 4294901760, %v586_v23  ;;  %3218 = vmatprep.subr.bf16.mxu1 %v3217_v24  ;;  %v3225_v51 = vpack.c.bf16 %v592_v22, %v580_v21 }
  0x18   : > { %v599_v33 = vand.u32 4294901760, %v598_v25  ;;  %v605_v34 = vand.u32 4294901760, %v604_v26  ;;  %v611_v35 = vand.u32 4294901760, %v610_v27  ;;  %3220 = vmatpush1.bf16.msra.mxu1 %v3219_v28  ;;  %v3227_v52 = vpack.c.bf16 %v598_v25, %v586_v23 }
  0x19   : > { %v582_v36 = vsub.f32 %v580_v21, %v581_v29  ;;  %v594_v37 = vsub.f32 %v592_v22, %v593_v30  ;;  %v588_v38 = vsub.f32 %v586_v23, %v587_v31  ;;  %506 = vmatprep.subr.mxu1 %v3661_v18  ;;  %v3233_v53 = vpack.c.bf16 %v593_v30, %v581_v29 }
  0x1a   : > { %v600_v39 = vsub.f32 %v598_v25, %v599_v33  ;;  %v606_v40 = vsub.f32 %v604_v26, %v605_v34  ;;  %v612_v46 = vsub.f32 %v610_v27, %v611_v35  ;;  %v3235_v54 = vpack.c.bf16 %v599_v33, %v587_v31 }
  0x1b   : > { %v583_v41 = vand.u32 4294901760, %v582_v36  ;;  %v595_v42 = vand.u32 4294901760, %v594_v37  ;;  %v589_v43 = vand.u32 4294901760, %v588_v38  ;;  %v1498_v29 = vlaneseq  ;;  %v1504_v36 = vld [vmem:[%s4161_s3 + $0x8] sm:$0xff] }
  0x1c   : > { %v601_v45 = vand.u32 4294901760, %v600_v39  ;;  %508 = vmatpush1.msra.mxu1 %v3663_v19  ;;  %v607_v48 = vand.u32 4294901760, %v606_v40  ;;  %v613_v50 = vand.u32 4294901760, %v612_v46  ;;  %v1627_v39 = vld [vmem:[%s4166_s8] sm:$0xff]  ;;  %v3191_v40 = vld [vmem:[%s4161_s3 + $0x10] sm:$0xff] }
  0x1d   : > { %v3221_v47 = vpack.c.bf16 %v595_v42, %v583_v41  ;;  %573 = vmatmul.mubr.f32.vlgmr.msra.gmra.mrb[0].mxu1 %v572_v44  ;;  %v3720_v30 = vand.u32 127, %v1498_v29  ;;  %v3192_v41 = vld [vmem:[%s4161_s3 + $0x18] sm:$0xff]  ;;  %v1636_v46 = vsel %vm1634_vm3, %v1627_v39, 0 }
  0x1e   : > { %v3223_v49 = vpack.c.bf16 %v601_v45, %v589_v43  ;;  %1093 = vmatprep.mubr.f32.mxu1 %v3546_v2 }
  0x1f   : > { %3222 = vmatprep.subr.bf16.mxu0 %v3221_v47  ;;  %vm1500_vm2 = vcmp.lt.s32.totalorder %v3720_v30, 17  ;;  %vm1513_vm4 = vcmp.lt.s32.totalorder %v3720_v30, 16  ;;  %v2311_v47 = vld [vmem:[%s4168_s10] sm:$0xff]  ;;  %vm1527_vm5 = vcmp.lt.s32.totalorder %v3720_v30, 15  ;;  %vm1541_vm6 = vcmp.lt.s32.totalorder %v3720_v30, 1 }
  0x20   : > { %3224 = vmatpush1.bf16.msra.mxu0 %v3223_v49  ;;  %vm1557_vm7 = vcmp.lt.s32.totalorder %v3720_v30, 127  ;;  %vm1571_vm8 = vcmp.lt.s32.totalorder %v3720_v30, 113  ;;  %vm1585_vm9 = vcmp.lt.s32.totalorder %v3720_v30, 112  ;;  %vm1599_vm10 = vcmp.lt.s32.totalorder %v3720_v30, 111 }
  0x21   : > { %608 = vmatprep.subr.mxu0 %v607_v48 }
  0x24   : > { %614 = vmatpush1.msra.mxu0 %v613_v50 }
  0x25   : > { %675 = vmatmul.mubr.f32.vlgmr.msra.gmra.mrb[0].mxu0 %v3653_v6  ;;  %3226 = vmatprep.subr.bf16.mxu0 %v3225_v51 }
  0x26   : > { %3228 = vmatpush1.bf16.msra.mxu0 %v3227_v52  ;;  %757 = vmatprep.mubr.f32.mxu0 %v3546_v2 }
  0x27   : > { %695 = vmatprep.subr.mxu0 %v604_v26 }
  0x2a   : > { %698 = vmatpush1.msra.mxu0 %v610_v27  ;;  %v1628_v27 = vld [vmem:[%s4167_s9] sm:$0xff] }
  0x2b   : > { %3230 = vmatprep.subr.bf16.mxu0 %v3217_v24 }
  0x2d   : > { %760 = vmatmul.mubr.f32.vlgmr.msra.gmra.mrb[0].mxu0 %v3659_v10 }
  0x2e   : > { %3232 = vmatpush1.bf16.msra.mxu0 %v3219_v28  ;;  %836 = vmatprep.mubr.f32.mxu0 %v3546_v2 }
  0x2f   : > { %775 = vmatprep.subr.mxu0 %v3661_v18 }
  0x32   : > { %777 = vmatpush1.msra.mxu0 %v3663_v19 }
  0x33   : > { %3234 = vmatprep.subr.bf16.mxu0 %v3233_v53  ;;  %v3747_v53 = vand.u32 4294901760, %v1636_v46 }
  0x35   : > { %840 = vmatmul.mubr.f32.vlgmr.msra.gmra.mrb[0].mxu0 %v570_v20 }
  0x36   : > { %3236 = vmatpush1.bf16.msra.mxu0 %v3235_v54  ;;  %928 = vmatprep.mubr.f32.mxu0 %v3546_v2  ;;  %v2319_v54 = vsel %vm1634_vm3, %v2311_v47, 0 }
  0x37   : > { %865 = vmatprep.subr.mxu0 %v605_v34 }
  0x3a   : > { %869 = vmatpush1.msra.mxu0 %v611_v35  ;;  %v1503_v35 = vld [vmem:[%s4161_s3] sm:$0xff] }
  0x3b   : > { %3238 = vmatprep.subr.bf16.mxu0 %v3217_v24 }
  0x3d   : > { %930 = vmatmul.mubr.f32.vlgmr.msra.gmra.mrb[0].mxu0 %v3653_v6 }
  0x3e   : > { %3240 = vmatpush1.bf16.msra.mxu0 %v3219_v28  ;;  %1006 = vmatprep.mubr.f32.mxu0 %v3546_v2  ;;  %v2312_v28 = vld [vmem:[%s4169_s11] sm:$0xff] }
  0x3f   : > { %945 = vmatprep.subr.mxu0 %v3661_v18 }
  0x42   : > { %947 = vmatpush1.msra.mxu0 %v3663_v19 }
  0x45   : > { %1008 = vmatmul.mubr.f32.vlgmr.msra.gmra.mrb[0].mxu0 %v3653_v6  ;;  %v1097_v6 = vsub.f32 %v1095_v60, %v1096_v0 }
  0x46   : > { %2403 = vmatprep.mubr.f32.mxu0 %v3546_v2 }
  0x47   : > { %v1098_v11 = vand.u32 4294901760, %v1097_v6 }
  0x87   : > { %v491_v61 = vpop.permute.xlu0 %490 }
  0x8b   : > { %v1021_v20 = vpop.permute.xlu0 %1020 }
  0xf0   : > { %v574_v55 = vpop.f32.mrb[0].mxu1 }
  0xf1   : > { %v576_v56 = vpop.f32.mrb[1].mxu1  ;;  %v575_v62 = vadd.f32 %v574_v55, %v491_v61 }
  0xf2   : > { %v577_v63 = vadd.f32 %v576_v56, %v491_v61 }
 0x118   : > { %v1009_v1 = vpop.f32.mrb[0].mxu0 }
 0x119   : > { %v3434_v3 = vadd.f32 %v1009_v1, %v575_v62  ;;  %v1011_v4 = vpop.f32.mrb[1].mxu0  ;;  %v3193_v1 = vld [vmem:[%s4161_s3 + $0x20] sm:$0xff] }
 0x11a   : > { %v3436_v5 = vadd.f32 %v1011_v4, %v577_v63  ;;  %v3196_v4 = vld [vmem:[%s4161_s3 + $0x38] sm:$0xff] }
 0x11b   : > { %v1014_v7 = vmax.f32 %v3434_v3, 0.0 }
 0x11c   : > { %v1015_v8 = vmax.f32 %v3436_v5, 0.0 }
 0x11d   : > { %v1029_v9 = vand.u32 4294901760, %v1014_v7 }
 0x11e   : > { %v1027_v10 = vand.u32 4294901760, %v1015_v8 }
 0x11f   : > { %v1112_v12 = vsub.f32 %v1014_v7, %v1029_v9  ;;  %v3771_v7 = vand.u32 4294901760, %v2319_v54 }
 0x120   : > { %v1106_v13 = vsub.f32 %v1015_v8, %v1027_v10  ;;  %1028 = vmatprep.subr.mxu1 %v1027_v10 }
 0x121   : > { %v1113_v14 = vand.u32 4294901760, %v1112_v12  ;;  %1030 = vmatpush1.msra.mxu1 %v1029_v9 }
 0x122   : > { %1099 = vmatmul.mubr.f32.vlgmr.msra.gmra.mrb[2].mxu1 %v1098_v11  ;;  %v1107_v15 = vand.u32 4294901760, %v1106_v13  ;;  %v3781_v11 = vsub.f32 %v1636_v46, %v3747_v53 }
 0x123   : > { %v1114_v16 = vsub.f32 %v1112_v12, %v1113_v14  ;;  %1179 = vmatprep.mubr.f32.mxu1 %v3546_v2 }
 0x124   : > { %v1108_v17 = vsub.f32 %v1106_v13, %v1107_v15 }
 0x125   : > { %v1115_v19 = vand.u32 4294901760, %v1114_v16 }
 0x126   : > { %v1109_v18 = vand.u32 4294901760, %v1108_v17  ;;  %v3197_v17 = vld [vmem:[%s4161_s3 + $0x50] sm:$0xff] }
 0x128   : > { %1110 = vmatprep.subr.mxu1 %v1109_v18  ;;  %v3198_v18 = vld [vmem:[%s4161_s3 + $0x58] sm:$0xff] }
 0x129   : > { %1116 = vmatpush1.msra.mxu1 %v1115_v19 }
 0x12a   : > { %1181 = vmatmul.mubr.f32.vlgmr.msra.gmra.mrb[2].mxu1 %v1094_v59  ;;  %1189 = vmatprep.subr.mxu1 %v1106_v13 }
 0x12b   : > { %1192 = vmatpush1.msra.mxu1 %v1112_v12  ;;  %1255 = vmatprep.mubr.f32.mxu1 %v3546_v2 }
 0x12c   : > { %1265 = vmatprep.subr.mxu1 %v1027_v10 }
 0x132   : > { %1258 = vmatmul.mubr.f32.vlgmr.msra.gmra.mrb[2].mxu1 %v1095_v60  ;;  %v3194_v60 = vld [vmem:[%s4161_s3 + $0x28] sm:$0xff] }
 0x133   : > { %1267 = vmatpush1.msra.mxu1 %v1029_v9  ;;  %1330 = vmatprep.mubr.f32.mxu1 %v3546_v2 }
 0x134   : > { %1343 = vmatprep.subr.mxu1 %v1107_v15 }
 0x13a   : > { %1334 = vmatmul.mubr.f32.vlgmr.msra.gmra.mrb[2].mxu1 %v1096_v0 }
 0x13b   : > { %1347 = vmatpush1.msra.mxu1 %v1113_v14  ;;  %1410 = vmatprep.mubr.f32.mxu1 %v3546_v2 }
 0x13c   : > { %1419 = vmatprep.subr.mxu1 %v1027_v10 }
 0x142   : > { %1412 = vmatmul.mubr.f32.vlgmr.msra.gmra.mrb[2].mxu1 %v1094_v59 }
 0x143   : > { %1421 = vmatpush1.msra.mxu1 %v1029_v9  ;;  %1484 = vmatprep.mubr.f32.mxu1 %v3546_v2  ;;  %v3195_v9 = vld [vmem:[%s4161_s3 + $0x30] sm:$0xff] }
 0x14a   : > { %1486 = vmatmul.mubr.f32.vlgmr.msra.gmra.mrb[2].mxu1 %v1094_v59 }
 0x14b   : > { %1720 = vmatprep.mubr.f32.mxu1 %v3546_v2 }
 0x21d   : > { %v1487_v21 = vpop.f32.mrb[2].mxu1 }
 0x21e   : > { %v3437_v22 = vadd.f32 %v1487_v21, %v1021_v20  ;;  %v1489_v23 = vpop.f32.mrb[3].mxu1 }
 0x21f   : > { %v3438_v25 = vadd.f32 %v1489_v23, %v1021_v20  ;;  %v3798_v20 = vsub.f32 %v2319_v54, %v3771_v7 }
 0x220   : > { %v3694_v24 = vmax.f32 %v3437_v22, 0.0 }
 0x221   : > { %v3698_v26 = vmax.f32 %v3438_v25, 0.0 }
 0x222   : > { %1509 = vrot.lane.b32.xlu0 %v3694_v24, %s3548_s23  ;;  %1494 = vrot.lane.b32.xlu1 %v3694_v24, %s3549_s24  ;;  %v1656_v52 = vand.u32 4294901760, %v3694_v24 }
 0x223   : > { %v1654_v5 = vand.u32 4294901760, %v3698_v26 }
 0x224   : > { %v3769_v6 = vsub.f32 %v3694_v24, %v1656_v52 }
 0x225   : > { %v3795_v19 = vsub.f32 %v3698_v26, %v1654_v5 }
 0x226   : > { %1523 = vrot.lane.b32.xlu0 %v3694_v24, %s3550_s27  ;;  %1496 = vrot.lane.b32.xlu1 %v3698_v26, %s3549_s24  ;;  %v1788_v21 = vand.u32 4294901760, %v3769_v6 }
 0x227   : > { %v4176_v46 = vand.u32 4294901760, %v3795_v19 }
 0x22a   : > { %1537 = vrot.lane.b32.xlu0 %v3694_v24, %s3551_s28  ;;  %1511 = vrot.lane.b32.xlu1 %v3698_v26, %s3548_s23 }
 0x22e   : > { %1553 = vrot.lane.b32.xlu0 %v3694_v24, %s3552_s29  ;;  %1525 = vrot.lane.b32.xlu1 %v3698_v26, %s3550_s27  ;;  %s479_s27 = scalar_lea.vmem %s4170_s12, %s3214_s22 }
 0x232   : > { %1567 = vrot.lane.b32.xlu0 %v3694_v24, %s3553_s30  ;;  %1539 = vrot.lane.b32.xlu1 %v3698_v26, %s3551_s28 }
 0x236   : > { %1581 = vrot.lane.b32.xlu0 %v3694_v24, %s3554_s15  ;;  %1555 = vrot.lane.b32.xlu1 %v3698_v26, %s3552_s29 }
 0x23a   : > { %1595 = vrot.lane.b32.xlu0 %v3694_v24, %s3555_s16  ;;  %1569 = vrot.lane.b32.xlu1 %v3698_v26, %s3553_s30 }
 0x23e   : > { %1631 = vperm.xlu0 %3509, %v1628_v27   ;;  %1583 = vrot.lane.b32.xlu1 %v3698_v26, %s3554_s15  ;;  %s3212_s15 = sshll.u32 %s3647_s14, 2  ;;  %s3215_s14 = scalar_lea.smem [#allocation3], %s3544_s25 }
 0x23f   : > { %s469_s18 = scalar_lea.vmem %s4159_s1, %s3212_s15  ;;  %s464_s21 = scalar_lea.vmem %s4158_s0, %s3212_s15 }
 0x240   : > { %s3216_s28 = scalar_lea.smem %s3215_s14, 4294967295 [#allocation3] }
 0x242   : > { %2315 = vperm.xlu0 %3509, %v2312_v28   ;;  %1597 = vrot.lane.b32.xlu1 %v3698_v26, %s3555_s16  ;;  %v1723_v28 = vand.u32 4294901760, %v3781_v11  ;;  %s3522_s16 = scalar_lea.hbm %s4171_s13, 16 }
 0x243   : > { %p3523_p5 = scmp.ne.s32.totalorder %s4171_s13, %s3522_s16  ;;  %p3528_p8 = scmp.lt.u32.totalorder %s3522_s16, %s4171_s13 }
 0x245   : > { %p3524_p6 = pnand %p3523_p5, %p3488_p4 }
 0x247   : > { %p3525_p7 = pneg %p3524_p6 }
 0x249   : > { %p3530_p9 = pnand %p3528_p8, %p3525_p7 }
 0x294   : > { %v1510_v31 = vpop.permute.xlu0 %1509  ;;  %v1495_v32 = vpop.permute.xlu1 %1494 }
 0x298   : > { %v1524_v33 = vpop.permute.xlu0 %1523  ;;  %v1497_v34 = vpop.permute.xlu1 %1496 }
 0x299   : > { %v1501_v37 = vsel %vm1500_vm2, %v1495_v32, %v1497_v34  ;;  %v1502_v38 = vsel %vm1500_vm2, %v1497_v34, %v1495_v32 }
 0x29a   : > { %v3739_v42 = vmul.f32 %v1503_v35, %v1502_v38  ;;  %v1506_v43 = vmul.f32 %v1504_v36, %v1501_v37 }
 0x29c   : > { %v1538_v44 = vpop.permute.xlu0 %1537  ;;  %v1512_v45 = vpop.permute.xlu1 %1511  ;;  %v1638_v55 = vand.u32 4294901760, %v1506_v43  ;;  %v1640_v56 = vand.u32 4294901760, %v3739_v42 }
 0x29d   : > { %v1514_v48 = vsel %vm1513_vm4, %v1510_v31, %v1512_v45  ;;  %v1515_v49 = vsel %vm1513_vm4, %v1512_v45, %v1510_v31  ;;  %v3828_v45 = vsub.f32 %v3781_v11, %v1723_v28 }
 0x29e   : > { %v1519_v50 = vmul.f32 %v3191_v40, %v1515_v49  ;;  %v1520_v51 = vmul.f32 %v3192_v41, %v1514_v48  ;;  %v2406_v40 = vand.u32 4294901760, %v3798_v20  ;;  %v3832_v47 = vsub.f32 %v3739_v42, %v1640_v56  ;;  %v3199_v48 = vld [vmem:[%s4161_s3 + $0x60] sm:$0xff]  ;;  %v3200_v49 = vld [vmem:[%s4161_s3 + $0x68] sm:$0xff] }
 0x2a0   : > { %v1642_v57 = vand.u32 4294901760, %v1520_v51  ;;  %v1644_v58 = vand.u32 4294901760, %v1519_v50  ;;  %v1526_v59 = vpop.permute.xlu1 %1525  ;;  %v1554_v0 = vpop.permute.xlu0 %1553  ;;  %v3868_v24 = vsub.f32 %v3798_v20, %v2406_v40 }
 0x2a1   : > { %v1528_v61 = vsel %vm1527_vm5, %v1524_v33, %v1526_v59  ;;  %v1529_v3 = vsel %vm1527_vm5, %v1526_v59, %v1524_v33  ;;  %v3809_v33 = vsub.f32 %v1506_v43, %v1638_v55  ;;  %v3201_v59 = vld [vmem:[%s4161_s3 + $0x70] sm:$0xff] }
 0x2a2   : > { %v3754_v62 = vpack.c.bf16 %v1642_v57, %v1638_v55  ;;  %v3756_v63 = vpack.c.bf16 %v1644_v58, %v1640_v56  ;;  %v3773_v8 = vmul.f32 %v3194_v60, %v1528_v61  ;;  %v3783_v12 = vmul.f32 %v3193_v1, %v1529_v3  ;;  %v3202_v60 = vld [vmem:[%s4161_s3 + $0x78] sm:$0xff] }
 0x2a3   : > { %v3815_v37 = vsub.f32 %v1520_v51, %v1642_v57  ;;  %v3817_v38 = vsub.f32 %v1519_v50, %v1644_v58  ;;  %v1734_v57 = vand.u32 4294901760, %v3809_v33 }
 0x2a4   : > { %3242 = vmatprep.subr.bf16.mxu1 %v3754_v62  ;;  %3338 = vmatprep.subr.bf16.mxu0 %v3754_v62  ;;  %v1540_v10 = vpop.permute.xlu1 %1539  ;;  %v1646_v22 = vand.u32 4294901760, %v3773_v8  ;;  %v1568_v23 = vpop.permute.xlu0 %1567  ;;  %v1648_v29 = vand.u32 4294901760, %v3783_v12 }
 0x2a5   : > { %v1542_v13 = vsel %vm1541_vm6, %v1538_v44, %v1540_v10  ;;  %3244 = vmatpush1.bf16.msra.mxu1 %v3756_v63  ;;  %3340 = vmatpush1.bf16.msra.mxu0 %v3756_v63  ;;  %v1543_v14 = vsel %vm1541_vm6, %v1540_v10, %v1538_v44  ;;  %v1752_v58 = vand.u32 4294901760, %v3817_v38  ;;  %v1746_v61 = vand.u32 4294901760, %v3815_v37 }
 0x2a6   : > { %v1548_v15 = vmul.f32 %v3196_v4, %v1542_v13  ;;  %v1547_v16 = vmul.f32 %v3195_v9, %v1543_v14  ;;  %v1725_v4 = vand.u32 4294901760, %v3828_v45 }
 0x2a8   : > { %v1650_v25 = vand.u32 4294901760, %v1548_v15  ;;  %v1556_v27 = vpop.permute.xlu1 %1555  ;;  %v1652_v31 = vand.u32 4294901760, %v1547_v16  ;;  %v1582_v54 = vpop.permute.xlu0 %1581 }
 0x2a9   : > { %v1558_v26 = vsel %vm1557_vm7, %v1554_v0, %v1556_v27  ;;  %v1559_v32 = vsel %vm1557_vm7, %v1556_v27, %v1554_v0 }
 0x2aa   : > { %v3811_v34 = vpack.c.bf16 %v1650_v25, %v1646_v22  ;;  %v3813_v35 = vmul.f32 %v3197_v17, %v1558_v26  ;;  %v1564_v36 = vmul.f32 %v3198_v18, %v1559_v32  ;;  %v3819_v39 = vpack.c.bf16 %v1652_v31, %v1648_v29 }
 0x2ab   : > { %v3847_v42 = vsub.f32 %v1548_v15, %v1650_v25  ;;  %v3879_v9 = vsub.f32 %v1547_v16, %v1652_v31  ;;  %v1735_v15 = vsub.f32 %v3809_v33, %v1734_v57  ;;  %v1753_v16 = vsub.f32 %v3817_v38, %v1752_v58 }
 0x2ac   : > { %v1658_v41 = vand.u32 4294901760, %v1564_v36  ;;  %v1660_v44 = vand.u32 4294901760, %v3813_v35  ;;  %3246 = vmatprep.subr.bf16.mxu1 %v3811_v34  ;;  %3342 = vmatprep.subr.bf16.mxu0 %v3811_v34  ;;  %v1570_v43 = vpop.permute.xlu1 %1569  ;;  %v3895_v18 = vsub.f32 %v3783_v12, %v1648_v29  ;;  %v1596_v25 = vpop.permute.xlu0 %1595  ;;  %v3204_v12 = vld [vmem:[%s4161_s3 + $0x88] sm:$0xff] }
 0x2ad   : > { %v1572_v50 = vsel %vm1571_vm8, %v1568_v23, %v1570_v43  ;;  %v1573_v51 = vsel %vm1571_vm8, %v1570_v43, %v1568_v23  ;;  %3248 = vmatpush1.bf16.msra.mxu1 %v3819_v39  ;;  %3344 = vmatpush1.bf16.msra.mxu0 %v3819_v39  ;;  %v4174_v17 = vand.u32 4294901760, %v3847_v42  ;;  %v1747_v23 = vsub.f32 %v3815_v37, %v1746_v61  ;;  %v3203_v43 = vld [vmem:[%s4161_s3 + $0x80] sm:$0xff] }
 0x2ae   : > { %v3849_v55 = vpack.c.bf16 %v1658_v41, %v1654_v5  ;;  %v3853_v56 = vpack.c.bf16 %v1660_v44, %v1656_v52  ;;  %v3871_v52 = vsub.f32 %v3773_v8, %v1646_v22  ;;  %v3873_v0 = vmul.f32 %v3199_v48, %v1572_v50 }
 0x2af   : > { %v1578_v1 = vmul.f32 %v3200_v49, %v1573_v51  ;;  %v1740_v5 = vand.u32 4294901760, %v3832_v47  ;;  %v3897_v22 = vsub.f32 %v1564_v36, %v1658_v41  ;;  %v4172_v36 = vand.u32 4294901760, %v3879_v9 }
 0x2b0   : > { %3250 = vmatprep.subr.bf16.mxu1 %v3849_v55  ;;  %3346 = vmatprep.subr.bf16.mxu0 %v3849_v55  ;;  %v1584_v3 = vpop.permute.xlu1 %1583  ;;  %v1664_v31 = vand.u32 4294901760, %v3873_v0  ;;  %v1758_v49 = vand.u32 4294901760, %v3871_v52  ;;  %v3916_v50 = vsub.f32 %v3813_v35, %v1660_v44  ;;  %v4175_v35 = vand.u32 4294901760, %v3895_v18 }
 0x2b1   : > { %v1586_v10 = vsel %vm1585_vm9, %v1582_v54, %v1584_v3  ;;  %v1587_v8 = vsel %vm1585_vm9, %v1584_v3, %v1582_v54  ;;  %3252 = vmatpush1.bf16.msra.mxu1 %v3853_v56  ;;  %3348 = vmatpush1.bf16.msra.mxu0 %v3853_v56  ;;  %v1662_v27 = vand.u32 4294901760, %v1578_v1  ;;  %v4173_v30 = vand.u32 4294901760, %v3897_v22 }
 0x2b2   : > { %v1591_v13 = vmul.f32 %v3201_v59, %v1586_v10  ;;  %v1592_v14 = vmul.f32 %v3202_v60, %v1587_v8  ;;  %v1771_v59 = vsub.f32 %v3847_v42, %v4174_v17  ;;  %v1741_v8 = vsub.f32 %v3832_v47, %v1740_v5 }
 0x2b3   : > { %v1748_v44 = vand.u32 4294901760, %v1747_v23  ;;  %v4177_v23 = vand.u32 4294901760, %v3916_v50 }
 0x2b4   : > { %v1666_v26 = vand.u32 4294901760, %v1592_v14  ;;  %v1668_v32 = vand.u32 4294901760, %v1591_v13  ;;  %v1598_v29 = vpop.permute.xlu1 %1597 }
 0x2b5   : > { %v1600_v41 = vsel %vm1599_vm10, %v1596_v25, %v1598_v29  ;;  %v1601_v48 = vsel %vm1599_vm10, %v1598_v29, %v1596_v25  ;;  %v2408_v25 = vand.u32 4294901760, %v3868_v24  ;;  %v3935_v29 = vsub.f32 %v1578_v1, %v1662_v27 }
 0x2b6   : > { %v3918_v51 = vpack.c.bf16 %v1666_v26, %v1662_v27  ;;  %v3920_v54 = vpack.c.bf16 %v1668_v32, %v1664_v31  ;;  %v3925_v60 = vsub.f32 %v1592_v14, %v1666_v26  ;;  %v1605_v3 = vmul.f32 %v3203_v43, %v1600_v41 }
 0x2b7   : > { %v1606_v10 = vmul.f32 %v3204_v12, %v1601_v48  ;;  %v1736_v26 = vand.u32 4294901760, %v1735_v15  ;;  %v1759_v43 = vsub.f32 %v3871_v52, %v1758_v49  ;;  %v1777_v12 = vsub.f32 %v3879_v9, %v4172_v36 }
 0x2b8   : > { %3254 = vmatprep.subr.bf16.mxu1 %v3918_v51  ;;  %3350 = vmatprep.subr.bf16.mxu0 %v3918_v51  ;;  %v3948_v24 = vsub.f32 %v1591_v13, %v1668_v32  ;;  %v1754_v1 = vand.u32 4294901760, %v1753_v16  ;;  %v3950_v27 = vand.u32 4294901760, %v1605_v3  ;;  %v1772_v15 = vand.u32 4294901760, %v1771_v59 }
 0x2b9   : > { %v3937_v14 = vand.u32 4294901760, %v1606_v10  ;;  %3256 = vmatpush1.bf16.msra.mxu1 %v3920_v54  ;;  %3352 = vmatpush1.bf16.msra.mxu0 %v3920_v54  ;;  %v1795_v41 = vsub.f32 %v3897_v22, %v4173_v30  ;;  %v1818_v48 = vand.u32 4294901760, %v3925_v60  ;;  %v1765_v36 = vsub.f32 %v3895_v18, %v4175_v35 }
 0x2ba   : > { %v3962_v13 = vsub.f32 %v3873_v0, %v1664_v31  ;;  %v3257_v16 = vpack.c.bf16 %v1748_v44, %v1736_v26  ;;  %v1742_v32 = vand.u32 4294901760, %v1741_v8  ;;  %v1760_v59 = vand.u32 4294901760, %v1759_v43 }
 0x2bb   : > { %1671 = vmatprep.subr.mxu1 %v3937_v14  ;;  %2354 = vmatprep.subr.mxu0 %v3937_v14  ;;  %v1783_v30 = vsub.f32 %v3795_v19, %v4176_v46  ;;  %v1806_v17 = vand.u32 4294901760, %v3935_v29  ;;  %v1801_v35 = vsub.f32 %v3916_v50, %v4177_v23  ;;  %v1824_v0 = vand.u32 4294901760, %v3948_v24 }
 0x2bc   : > { %v3259_v31 = vpack.c.bf16 %v1754_v1, %v1742_v32  ;;  %v1778_v8 = vand.u32 4294901760, %v1777_v12  ;;  %v3975_v44 = vsub.f32 %v1606_v10, %v3937_v14  ;;  %v3261_v26 = vpack.c.bf16 %v1772_v15, %v1760_v59 }
 0x2bd   : > { %1673 = vmatpush1.msra.mxu1 %v3950_v27  ;;  %2356 = vmatpush1.msra.mxu0 %v3950_v27  ;;  %v1796_v43 = vand.u32 4294901760, %v1795_v41  ;;  %v1819_v46 = vsub.f32 %v3925_v60, %v1818_v48  ;;  %v1812_v23 = vand.u32 4294901760, %v3962_v13  ;;  %v1789_v10 = vsub.f32 %v3769_v6, %v1788_v21 }
 0x2be   : > { %3258 = vmatprep.subr.bf16.mxu1 %v3257_v16  ;;  %3354 = vmatprep.subr.bf16.mxu0 %v3257_v16  ;;  %v1766_v16 = vand.u32 4294901760, %v1765_v36  ;;  %v1784_v45 = vand.u32 4294901760, %v1783_v30  ;;  %v3993_v12 = vsub.f32 %v1605_v3, %v3950_v27  ;;  %v1802_v36 = vand.u32 4294901760, %v1801_v35 }
 0x2bf   : > { %1726 = vmatmul.mubr.f32.vlgmr.msra.gmra.mrb[4].mxu1 %v1725_v4  ;;  %2409 = vmatmul.mubr.f32.vlgmr.msra.gmra.mrb[2].mxu0 %v2408_v25  ;;  %v1807_v4 = vsub.f32 %v3935_v29, %v1806_v17  ;;  %v1825_v25 = vsub.f32 %v3948_v24, %v1824_v0  ;;  %v1820_v41 = vand.u32 4294901760, %v1819_v46  ;;  %v3998_v30 = vand.u32 4294901760, %v3975_v44 }
 0x2c0   : > { %3260 = vmatpush1.bf16.msra.mxu1 %v3259_v31  ;;  %3356 = vmatpush1.bf16.msra.mxu0 %v3259_v31  ;;  %v3263_v1 = vpack.c.bf16 %v1778_v8, %v1766_v16  ;;  %v3265_v15 = vpack.c.bf16 %v1796_v43, %v1784_v45  ;;  %v1813_v32 = vsub.f32 %v3962_v13, %v1812_v23  ;;  %v1790_v59 = vand.u32 4294901760, %v1789_v10 }
 0x2c1   : > { %3262 = vmatprep.subr.bf16.mxu1 %v3261_v26  ;;  %3358 = vmatprep.subr.bf16.mxu0 %v3261_v26  ;;  %v1808_v3 = vand.u32 4294901760, %v1807_v4  ;;  %v1826_v31 = vand.u32 4294901760, %v1825_v25  ;;  %v4004_v8 = vand.u32 4294901760, %v3993_v12  ;;  %v1831_v46 = vsub.f32 %v3975_v44, %v3998_v30 }
 0x2c2   : > { %1886 = vmatprep.mubr.f32.mxu1 %v3546_v2  ;;  %2569 = vmatprep.mubr.f32.mxu0 %v3546_v2  ;;  %v3267_v35 = vpack.c.bf16 %v1802_v36, %v1790_v59  ;;  %v1814_v43 = vand.u32 4294901760, %v1813_v32  ;;  %v3273_v25 = vpack.c.bf16 %v3815_v37, %v3809_v33  ;;  %v3277_v36 = vpack.c.bf16 %v3847_v42, %v3871_v52 }
 0x2c3   : > { %v3269_v26 = vpack.c.bf16 %v1820_v41, %v1808_v3  ;;  %v1837_v10 = vsub.f32 %v3993_v12, %v4004_v8  ;;  %v1832_v45 = vand.u32 4294901760, %v1831_v46  ;;  %v3281_v41 = vpack.c.bf16 %v3897_v22, %v3795_v19 }
 0x2c4   : > { %3264 = vmatpush1.bf16.msra.mxu1 %v3263_v1  ;;  %3360 = vmatpush1.bf16.msra.mxu0 %v3263_v1  ;;  %v3271_v16 = vpack.c.bf16 %v1826_v31, %v1814_v43  ;;  %v3275_v1 = vpack.c.bf16 %v3817_v38, %v3832_v47  ;;  %v3283_v32 = vpack.c.bf16 %v3916_v50, %v3769_v6  ;;  %v4178_v33 = vand.u32 4294901760, %v3847_v42 }
 0x2c5   : > { %3266 = vmatprep.subr.bf16.mxu1 %v3265_v15  ;;  %3362 = vmatprep.subr.bf16.mxu0 %v3265_v15  ;;  %v1838_v4 = vand.u32 4294901760, %v1837_v10  ;;  %v3279_v15 = vpack.c.bf16 %v3879_v9, %v3895_v18  ;;  %v3285_v59 = vpack.c.bf16 %v3925_v60, %v3935_v29  ;;  %v3287_v3 = vpack.c.bf16 %v3948_v24, %v3962_v13  ;;  %v3206_v24 = vld.sshfl [vmem:[%s464_s21] sm:$0x33 pattern:$0x76325410] }
 0x2c6   : > { %v3309_v37 = vpack.c.bf16 %v4178_v33, %v1758_v49  ;;  %v4179_v47 = vand.u32 4294901760, %v3895_v18  ;;  %v4180_v38 = vand.u32 4294901760, %v3879_v9  ;;  %v3045_v10 = vcombine.high %v3206_v24, %v3206_v24 }
 0x2c8   : > { %3268 = vmatpush1.bf16.msra.mxu1 %v3267_v35  ;;  %3364 = vmatpush1.bf16.msra.mxu0 %v3267_v35 }
 0x2c9   : > { %3270 = vmatprep.subr.bf16.mxu1 %v3269_v26  ;;  %3366 = vmatprep.subr.bf16.mxu0 %v3269_v26 }
 0x2cc   : > { %3272 = vmatpush1.bf16.msra.mxu1 %v3271_v16  ;;  %3368 = vmatpush1.bf16.msra.mxu0 %v3271_v16 }
 0x2cd   : > { %1833 = vmatprep.subr.mxu1 %v1832_v45  ;;  %2516 = vmatprep.subr.mxu0 %v1832_v45 }
 0x2d0   : > { %1839 = vmatpush1.msra.mxu1 %v1838_v4  ;;  %2522 = vmatpush1.msra.mxu0 %v1838_v4 }
 0x2d1   : > { %3274 = vmatprep.subr.bf16.mxu1 %v3273_v25  ;;  %3370 = vmatprep.subr.bf16.mxu0 %v3273_v25 }
 0x2d2   : > { %1888 = vmatmul.mubr.f32.vlgmr.msra.gmra.mrb[4].mxu1 %v3747_v53  ;;  %2571 = vmatmul.mubr.f32.vlgmr.msra.gmra.mrb[2].mxu0 %v3771_v7 }
 0x2d3   : > { %3276 = vmatpush1.bf16.msra.mxu1 %v3275_v1  ;;  %3372 = vmatpush1.bf16.msra.mxu0 %v3275_v1 }
 0x2d4   : > { %3278 = vmatprep.subr.bf16.mxu1 %v3277_v36  ;;  %3374 = vmatprep.subr.bf16.mxu0 %v3277_v36 }
 0x2d5   : > { %1994 = vmatprep.mubr.f32.mxu1 %v3546_v2  ;;  %2677 = vmatprep.mubr.f32.mxu0 %v3546_v2 }
 0x2d7   : > { %3280 = vmatpush1.bf16.msra.mxu1 %v3279_v15  ;;  %3376 = vmatpush1.bf16.msra.mxu0 %v3279_v15 }
 0x2d8   : > { %3282 = vmatprep.subr.bf16.mxu1 %v3281_v41  ;;  %3378 = vmatprep.subr.bf16.mxu0 %v3281_v41 }
 0x2db   : > { %3284 = vmatpush1.bf16.msra.mxu1 %v3283_v32  ;;  %3380 = vmatpush1.bf16.msra.mxu0 %v3283_v32 }
 0x2dc   : > { %3286 = vmatprep.subr.bf16.mxu1 %v3285_v59  ;;  %3382 = vmatprep.subr.bf16.mxu0 %v3285_v59 }
 0x2df   : > { %3288 = vmatpush1.bf16.msra.mxu1 %v3287_v3  ;;  %3384 = vmatpush1.bf16.msra.mxu0 %v3287_v3 }
 0x2e0   : > { %1944 = vmatprep.subr.mxu1 %v3975_v44  ;;  %2627 = vmatprep.subr.mxu0 %v3975_v44  ;;  %v3305_v44 = vpack.c.bf16 %v1746_v61, %v1734_v57  ;;  %v3311_v57 = vpack.c.bf16 %v4180_v38, %v4179_v47 }
 0x2e3   : > { %1947 = vmatpush1.msra.mxu1 %v3993_v12  ;;  %2630 = vmatpush1.msra.mxu0 %v3993_v12  ;;  %v3307_v12 = vpack.c.bf16 %v1752_v58, %v1740_v5  ;;  %v3317_v58 = vpack.c.bf16 %v1818_v48, %v1806_v17 }
 0x2e4   : > { %3290 = vmatprep.subr.bf16.mxu1 %v3754_v62  ;;  %3386 = vmatprep.subr.bf16.mxu0 %v3754_v62 }
 0x2e5   : > { %1997 = vmatmul.mubr.f32.vlgmr.msra.gmra.mrb[4].mxu1 %v3781_v11  ;;  %2680 = vmatmul.mubr.f32.vlgmr.msra.gmra.mrb[2].mxu0 %v3798_v20  ;;  %v4181_v11 = vand.u32 4294901760, %v3795_v19  ;;  %v4182_v20 = vand.u32 4294901760, %v3897_v22  ;;  %v3319_v19 = vpack.c.bf16 %v1824_v0, %v1812_v23  ;;  %v3205_v22 = vld.sshfl [vmem:[%s469_s18] sm:$0x33 pattern:$0x76325410] }
 0x2e6   : > { %3292 = vmatpush1.bf16.msra.mxu1 %v3756_v63  ;;  %3388 = vmatpush1.bf16.msra.mxu0 %v3756_v63 }
 0x2e7   : > { %3294 = vmatprep.subr.bf16.mxu1 %v3811_v34  ;;  %3390 = vmatprep.subr.bf16.mxu0 %v3811_v34 }
 0x2e8   : > { %2085 = vmatprep.mubr.f32.mxu1 %v3546_v2  ;;  %2768 = vmatprep.mubr.f32.mxu0 %v3546_v2 }
 0x2ea   : > { %3296 = vmatpush1.bf16.msra.mxu1 %v3819_v39  ;;  %3392 = vmatpush1.bf16.msra.mxu0 %v3819_v39 }
 0x2eb   : > { %3298 = vmatprep.subr.bf16.mxu1 %v3849_v55  ;;  %3394 = vmatprep.subr.bf16.mxu0 %v3849_v55 }
 0x2ee   : > { %3300 = vmatpush1.bf16.msra.mxu1 %v3853_v56  ;;  %3396 = vmatpush1.bf16.msra.mxu0 %v3853_v56 }
 0x2ef   : > { %3302 = vmatprep.subr.bf16.mxu1 %v3918_v51  ;;  %3398 = vmatprep.subr.bf16.mxu0 %v3918_v51 }
 0x2f2   : > { %3304 = vmatpush1.bf16.msra.mxu1 %v3920_v54  ;;  %3400 = vmatpush1.bf16.msra.mxu0 %v3920_v54 }
 0x2f3   : > { %2036 = vmatprep.subr.mxu1 %v3937_v14  ;;  %2719 = vmatprep.subr.mxu0 %v3937_v14 }
 0x2f6   : > { %2038 = vmatpush1.msra.mxu1 %v3950_v27  ;;  %2721 = vmatpush1.msra.mxu0 %v3950_v27 }
 0x2f7   : > { %3306 = vmatprep.subr.bf16.mxu1 %v3305_v44  ;;  %3402 = vmatprep.subr.bf16.mxu0 %v3305_v44 }
 0x2f8   : > { %2089 = vmatmul.mubr.f32.vlgmr.msra.gmra.mrb[4].mxu1 %v1723_v28  ;;  %2772 = vmatmul.mubr.f32.vlgmr.msra.gmra.mrb[2].mxu0 %v2406_v40  ;;  %v3313_v28 = vpack.c.bf16 %v4182_v20, %v4181_v11  ;;  %v4183_v40 = vand.u32 4294901760, %v3916_v50 }
 0x2f9   : > { %3308 = vmatpush1.bf16.msra.mxu1 %v3307_v12  ;;  %3404 = vmatpush1.bf16.msra.mxu0 %v3307_v12 }
 0x2fa   : > { %3310 = vmatprep.subr.bf16.mxu1 %v3309_v37  ;;  %3406 = vmatprep.subr.bf16.mxu0 %v3309_v37  ;;  %v3315_v42 = vpack.c.bf16 %v4183_v40, %v1788_v21 }
 0x2fb   : > { %2213 = vmatprep.mubr.f32.mxu1 %v3546_v2  ;;  %2896 = vmatprep.mubr.f32.mxu0 %v3546_v2 }
 0x2fd   : > { %3312 = vmatpush1.bf16.msra.mxu1 %v3311_v57  ;;  %3408 = vmatpush1.bf16.msra.mxu0 %v3311_v57 }
 0x2fe   : > { %3314 = vmatprep.subr.bf16.mxu1 %v3313_v28  ;;  %3410 = vmatprep.subr.bf16.mxu0 %v3313_v28 }
 0x301   : > { %3316 = vmatpush1.bf16.msra.mxu1 %v3315_v42  ;;  %3412 = vmatpush1.bf16.msra.mxu0 %v3315_v42 }
 0x302   : > { %3318 = vmatprep.subr.bf16.mxu1 %v3317_v58  ;;  %3414 = vmatprep.subr.bf16.mxu0 %v3317_v58 }
 0x305   : > { %3320 = vmatpush1.bf16.msra.mxu1 %v3319_v19  ;;  %3416 = vmatpush1.bf16.msra.mxu0 %v3319_v19 }
 0x306   : > { %2162 = vmatprep.subr.mxu1 %v3998_v30  ;;  %2845 = vmatprep.subr.mxu0 %v3998_v30 }
 0x309   : > { %2166 = vmatpush1.msra.mxu1 %v4004_v8  ;;  %2849 = vmatpush1.msra.mxu0 %v4004_v8 }
 0x30a   : > { %3322 = vmatprep.subr.bf16.mxu1 %v3754_v62  ;;  %3418 = vmatprep.subr.bf16.mxu0 %v3754_v62 }
 0x30b   : > { %2215 = vmatmul.mubr.f32.vlgmr.msra.gmra.mrb[4].mxu1 %v3747_v53  ;;  %2898 = vmatmul.mubr.f32.vlgmr.msra.gmra.mrb[2].mxu0 %v3771_v7 }
 0x30c   : > { %3324 = vmatpush1.bf16.msra.mxu1 %v3756_v63  ;;  %3420 = vmatpush1.bf16.msra.mxu0 %v3756_v63 }
 0x30d   : > { %3326 = vmatprep.subr.bf16.mxu1 %v3811_v34  ;;  %3422 = vmatprep.subr.bf16.mxu0 %v3811_v34 }
 0x30e   : > { %2303 = vmatprep.mubr.f32.mxu1 %v3546_v2  ;;  %2986 = vmatprep.mubr.f32.mxu0 %v3546_v2  ;;  %v1632_v2 = vpop.permute.xlu0 %1631 }
 0x310   : > { %3328 = vmatpush1.bf16.msra.mxu1 %v3819_v39  ;;  %3424 = vmatpush1.bf16.msra.mxu0 %v3819_v39 }
 0x311   : > { %3330 = vmatprep.subr.bf16.mxu1 %v3849_v55  ;;  %3426 = vmatprep.subr.bf16.mxu0 %v3849_v55 }
 0x312   : > { %v2316_v23 = vpop.permute.xlu0 %2315 }
 0x314   : > { %3332 = vmatpush1.bf16.msra.mxu1 %v3853_v56  ;;  %3428 = vmatpush1.bf16.msra.mxu0 %v3853_v56 }
 0x315   : > { %3334 = vmatprep.subr.bf16.mxu1 %v3918_v51  ;;  %3430 = vmatprep.subr.bf16.mxu0 %v3918_v51  ;;  %v3029_v51 = vcombine.high %v3205_v22, %v3205_v22 }
 0x318   : > { %3336 = vmatpush1.bf16.msra.mxu1 %v3920_v54  ;;  %3432 = vmatpush1.bf16.msra.mxu0 %v3920_v54 }
 0x319   : > { %2254 = vmatprep.subr.mxu1 %v3937_v14  ;;  %2937 = vmatprep.subr.mxu0 %v3937_v14 }
 0x31c   : > { %2256 = vmatpush1.msra.mxu1 %v3950_v27  ;;  %2939 = vmatpush1.msra.mxu0 %v3950_v27 }
 0x31d   : > { %2305 = vmatmul.mubr.f32.vlgmr.msra.gmra.mrb[4].mxu1 %v3747_v53  ;;  %2988 = vmatmul.mubr.f32.vlgmr.msra.gmra.mrb[2].mxu0 %v3771_v7 }
 0x3f0   : > { %v2306_v62 = vpop.f32.mrb[4].mxu1  ;;  %v2989_v63 = vpop.f32.mrb[2].mxu0 }
 0x3f1   : > { %v3439_v6 = vadd.f32 %v2306_v62, %v1632_v2  ;;  %v2308_v21 = vpop.f32.mrb[5].mxu1  ;;  %v2991_v34 = vpop.f32.mrb[3].mxu0  ;;  %v3441_v0 = vadd.f32 %v2989_v63, %v2316_v23 }
 0x3f2   : > { %v3440_v39 = vadd.f32 %v2308_v21, %v1632_v2  ;;  %v3442_v8 = vadd.f32 %v2991_v34, %v2316_v23 }
 0x3f3   : > { %v2994_v55 = vand.u32 2147483647, %v3439_v6  ;;  %vm3012_vm11 = vcmp.ge.f32.partialorder %v3439_v6, 0.0  ;;  %v3004_v13 = vmin.f32 %v3439_v6, 0.0 }
 0x3f4   : > { %v2995_v56 = vand.u32 2147483647, %v3440_v39  ;;  %vm3013_vm12 = vcmp.ge.f32.partialorder %v3440_v39, 0.0  ;;  %v3005_v31 = vmin.f32 %v3440_v39, 0.0 }
 0x3f5   : > { %v2996_v61 = vsub.f32 0.0, %v2994_v55 }
 0x3f6   : > { %v2997_v52 = vsub.f32 0.0, %v2995_v56 }
 0x3f7   : > { %v2998_v5 = vmul.f32 1.442695, %v2996_v61 }
 0x3f8   : > { %v3000_v9 = vmul.f32 1.442695, %v2997_v52 }
 0x3f9   : > { %3510 = vpow2.f32 %v2998_v5 }
 0x3fa   : > { %3512 = vpow2.f32 %v3000_v9 }
 0x403   : > { %v3511_v17 = vpop.eup %3510 }
 0x404   : > { %v3513_v53 = vpop.eup %3512  ;;  %v3002_v18 = vadd.f32 1.0, %v3511_v17  ;;  %v3014_v50 = vsel %vm3012_vm11, 1.0, %v3511_v17 }
 0x405   : > { %v3003_v7 = vadd.f32 1.0, %v3513_v53  ;;  %v3015_v29 = vsel %vm3013_vm12, 1.0, %v3513_v53 }
 0x406   : > { %3514 = vrcp.f32 %v3002_v18 }
 0x407   : > { %3516 = vrcp.f32 %v3003_v7 }
 0x408   : > { %3518 = vlog2.f32 %v3002_v18 }
 0x409   : > { %3520 = vlog2.f32 %v3003_v7 }
 0x410   : > { %v3515_v49 = vpop.eup %3514 }
 0x411   : > { %v3517_v54 = vpop.eup %3516  ;;  %v3017_v60 = vmul.f32 %v3515_v49, %v3014_v50 }
 0x412   : > { %v3519_v14 = vpop.eup %3518  ;;  %v3019_v27 = vmul.f32 %v3517_v54, %v3015_v29 }
 0x413   : > { %v3521_v48 = vpop.eup %3520  ;;  %v3032_v30 = vmul.f32 %v3205_v22, %v3017_v60  ;;  %v3007_v35 = vmul.f32 0.6931472, %v3519_v14 }
 0x414   : > { %v3033_v26 = vmul.f32 %v3029_v51, %v3019_v27  ;;  %v3009_v46 = vmul.f32 0.6931472, %v3521_v48 }
 0x415   : > { %v3034_v43 = vadd.f32 %v3441_v0, %v3032_v30  ;;  %v3010_v16 = vsub.f32 %v3004_v13, %v3007_v35 }
 0x416   : > { %v3035_v45 = vadd.f32 %v3442_v8, %v3033_v26  ;;  %v3011_v4 = vsub.f32 %v3005_v31, %v3009_v46 }
 0x417   : > { %v3050_v25 = vrot.slane %v3034_v43, 6  ;;  %v3062_v1 = vsel %vm3054_vm13, %v3010_v16, 0.0 }
 0x418   : > { %v3051_v36 = vrot.slane %v3035_v45, 6  ;;  %v3063_v15 = vsel %vm3054_vm13, %v3011_v4, 0.0 }
 0x419   : > { %v3064_v41 = vadd.f32 %v3063_v15, %v3062_v1  ;;  %v3055_v32 = vsel %vm3054_vm13, %v3206_v24, %v3050_v25 }
 0x41a   : > { %v3056_v59 = vsel %vm3054_vm13, %v3045_v10, %v3051_v36 }
 0x41b   : > { %3065 = vadd.xlane.f32.xlu1 %v3064_v41  ;;  %v3059_v3 = vcombine.low %v3055_v32, %v3056_v59 }
 0x41d   : > { %3061 = vst [vmem:[%s479_s27] sm:$0xff] %v3059_v3 }
 0x4a8   : > { %v3066_v44 = vpop.xlane.xlu1 %3065 }
 0x4a9   : > { %v3067_v12 = vrot.slane %v3066_v44, 4 }
 0x4ab   : > { %v3068_v33 = vadd.f32 %v3067_v12, %v3066_v44 }
 0x4ad   : > { %v3069_v37 = vrot.slane %v3068_v33, 2 }
 0x4af   : > { %v3070_v47 = vadd.f32 %v3069_v37, %v3068_v33 }
 0x4b1   : > { %v3071_v38 = vrot.slane %v3070_v47, 1 }
 0x4b3   : > { %v3072_v57 = vadd.f32 %v3071_v38, %v3070_v47 }
 0x4b5   : > { %3482 = vpush %v3072_v57 }
 0x4e6   : > { %s3483_s29 = spop %3482 }
 0x4e7   : > { %3075 = sst [smem:[%s3216_s28]] %s3483_s29 }
 0x4e8   : > { %3533 = shalt.err (!%p3530_p9)
}
 0x4e9   : > { %s3556_s21 = smov [#allocation3]  }
 0x4ea   : > { %3485 = dma.smem_to_hbm (%p3488_p4), %s3556_s21, 16, %s4171_s13, [#allocation4]  }
 0x4eb   : > { %3539 = dma.done.wait (%p3488_p4), [#allocation4], 16  }
 0x4ec   : > { %3541 = vsyncadd (%p3488_p4), [#allocation4], 4294967280 }
 0x4ed   : > { %3097 = sfence }
 0x4ee PF: > { %s25_s25 = sadd.s32 1, %s3544_s25  }
 0x4ef   : > { %p22_p10 = scmp.ge.s32.totalorder %s25_s25, 4  }
 0x4f1   :  { %24 = sbr.rel (!%p22_p10) target bundleno = 1 (0x1), region = 121 }
 0x4f8   :  { %3111 = vsyncpa [#allocation4], 1 }
 0x4f9   :  { %3113 = vsyncpa [#allocation4 + $0x1], 1 }

</bundles_post_ra>
